<compile_context>
chip_gen: v5e
topology: v5e:2x2
jax: 0.10.0
libtpu: 0.0.40
codegen_flags: <defaults>
</compile_context>

<pallas_src>
import jax
import jax.numpy as jnp
from jax.experimental import pallas as pl
from jax.experimental.pallas import tpu as pltpu


_VMEM_BUDGET = 40 * 1024 * 1024   # decision budget: safe on v7x's 64 MiB VMEM
_VMEM_LIMIT = 48 * 1024 * 1024    # scoped VMEM limit for the pallas_call
_TM_PREF = 512
_TN_PREF = 512
_TK_PREF = 512                    # fallback K tile (only used when K not collapsed)


def _round_up(v, m):
    return (v + m - 1) // m * m


def _tile(dim, pref, align):
    """Pick a tile size (multiple of `align`, capped at `pref`) and padded dim."""
    assert pref % align == 0, f"tile pref {pref} must be a multiple of align {align}"
    if dim <= pref:
        t = _round_up(dim, align)
        return t, t
    return pref, _round_up(dim, pref)


# ----------------------------- kernels --------------------------------------

def _sum_fusion_kernel_fused_k(x_ref, y_ref, wx_ref, wy_ref, b_ref, out_ref):
    """2-D grid (N, M): full-depth K, no accumulator scratch."""
    acc = jnp.dot(x_ref[...], wx_ref[...], preferred_element_type=jnp.float32)
    acc += jnp.dot(y_ref[...], wy_ref[...], preferred_element_type=jnp.float32)
    out_ref[...] = (acc + b_ref[...]).astype(out_ref.dtype)


def _sum_fusion_kernel_tiled_k(x_ref, y_ref, wx_ref, wy_ref, b_ref, out_ref, acc_ref):
    """3-D grid (N, M, K) fallback for very large D_in: f32 VMEM accumulator."""
    k = pl.program_id(2)

    @pl.when(k == 0)
    def _init():
        acc_ref[...] = jnp.zeros_like(acc_ref)

    acc_ref[...] += jnp.dot(x_ref[...], wx_ref[...], preferred_element_type=jnp.float32)
    acc_ref[...] += jnp.dot(y_ref[...], wy_ref[...], preferred_element_type=jnp.float32)

    @pl.when(k == pl.num_programs(2) - 1)
    def _finalize():
        out_ref[...] = (acc_ref[...] + b_ref[...]).astype(out_ref.dtype)


# ------------------------- parameter preparation ----------------------------

def prepare_sum_fusion_params(wx, bx, wy, by, *, compute_dtype=jnp.float32):
    """One-time parameter prep (weight transpose/pad, bias combine) hoisted
    out of the per-call path.

    wx, wy : (D_out, D_in)  -- PyTorch nn.Linear weight layout
    bx, by : (D_out,)
    """
    d_out, d_in = wx.shape
    assert wy.shape == (d_out, d_in) and bx.shape == (d_out,) and by.shape == (d_out,)

    cbytes = jnp.dtype(compute_dtype).itemsize
    tn, np_ = _tile(d_out, _TN_PREF, 128)

    # Collapse K (single full-depth dot, 2-D grid) if the double-buffered
    # working set at the largest M tile fits the VMEM budget.
    kp_full = _round_up(d_in, 128)
    est_fused = 2 * cbytes * (2 * _TM_PREF * kp_full   # x, y activation tiles
                              + 2 * kp_full * tn       # wx.T, wy.T tiles
                              + tn)                    # combined bias
    est_fused += 2 * 4 * _TM_PREF * tn                 # output tile (f32 worst case)
    if est_fused <= _VMEM_BUDGET:
        tk, kp = kp_full, kp_full
    else:
        tk, kp = _tile(d_in, _TK_PREF, 128)

    wxt = jnp.pad(wx.T.astype(compute_dtype), ((0, kp - d_in), (0, np_ - d_out)))
    wyt = jnp.pad(wy.T.astype(compute_dtype), ((0, kp - d_in), (0, np_ - d_out)))

    # Combined bias (bx + by), kept in f32, added once per output tile.
    b = (bx.astype(jnp.float32) + by.astype(jnp.float32)).reshape(1, d_out)
    b = jnp.pad(b, ((0, 0), (0, np_ - d_out)))

    return dict(wxt=wxt, wyt=wyt, b=b, d_in=d_in, d_out=d_out,
                tk=tk, tn=tn, compute_dtype=compute_dtype)


# ------------------------------- forward ------------------------------------

def sum_fusion(x, y, params):
    """SumFusion forward: returns (x, y, fc_x(x) + fc_y(y))."""
    d_in, d_out = params["d_in"], params["d_out"]
    wxt, wyt, b = params["wxt"], params["wyt"], params["b"]
    tk, tn = params["tk"], params["tn"]
    cdt = params["compute_dtype"]

    batch = x.shape[0]
    assert x.shape == (batch, d_in) and y.shape == (batch, d_in)

    kp, np_ = wxt.shape
    tm, mp = _tile(batch, _TM_PREF, 8)

    def prep_act(a):
        a = a.astype(cdt)
        if mp != batch or kp != d_in:
            a = jnp.pad(a, ((0, mp - batch), (0, kp - d_in)))
        return a

    xp, yp = prep_act(x), prep_act(y)

    grid_n, grid_m, grid_k = np_ // tn, mp // tm, kp // tk

    cbytes = jnp.dtype(cdt).itemsize
    cost = pl.CostEstimate(
        flops=2 * 2 * mp * kp * np_,
        transcendentals=0,
        bytes_accessed=(xp.size + yp.size + wxt.size + wyt.size) * cbytes
        + b.size * 4 + mp * np_ * jnp.dtype(x.dtype).itemsize,
    )

    if grid_k == 1:
        # Fused-K path: N outer / M inner -> the weight tiles' block indices
        # depend only on j, so they stay VMEM-resident across the whole M sweep.
        out = pl.pallas_call(
            _sum_fusion_kernel_fused_k,
            out_shape=jax.ShapeDtypeStruct((mp, np_), x.dtype),
            grid_spec=pltpu.PrefetchScalarGridSpec(
                num_scalar_prefetch=0,
                grid=(grid_n, grid_m),
                in_specs=[
                    pl.BlockSpec((tm, kp), lambda j, i: (i, 0)),   # x tile
                    pl.BlockSpec((tm, kp), lambda j, i: (i, 0)),   # y tile
                    pl.BlockSpec((kp, tn), lambda j, i: (0, j)),   # wx.T (resident)
                    pl.BlockSpec((kp, tn), lambda j, i: (0, j)),   # wy.T (resident)
                    pl.BlockSpec((1, tn), lambda j, i: (0, j)),    # combined bias
                ],
                out_specs=pl.BlockSpec((tm, tn), lambda j, i: (i, j)),
            ),
            compiler_params=pltpu.CompilerParams(
                dimension_semantics=("parallel", "parallel"),
                vmem_limit_bytes=_VMEM_LIMIT,
            ),
            cost_estimate=cost,
        )(xp, yp, wxt, wyt, b)
    else:
        # Fallback for very large D_in: K-tiled reduction, f32 accumulator,
        # reduction axis last and marked "arbitrary".
        out = pl.pallas_call(
            _sum_fusion_kernel_tiled_k,
            out_shape=jax.ShapeDtypeStruct((mp, np_), x.dtype),
            grid_spec=pltpu.PrefetchScalarGridSpec(
                num_scalar_prefetch=0,
                grid=(grid_n, grid_m, grid_k),
                in_specs=[
                    pl.BlockSpec((tm, tk), lambda j, i, k: (i, k)),
                    pl.BlockSpec((tm, tk), lambda j, i, k: (i, k)),
                    pl.BlockSpec((tk, tn), lambda j, i, k: (k, j)),
                    pl.BlockSpec((tk, tn), lambda j, i, k: (k, j)),
                    pl.BlockSpec((1, tn), lambda j, i, k: (0, j)),
                ],
                out_specs=pl.BlockSpec((tm, tn), lambda j, i, k: (i, j)),
                scratch_shapes=[pltpu.VMEM((tm, tn), jnp.float32)],
            ),
            compiler_params=pltpu.CompilerParams(
                dimension_semantics=("parallel", "parallel", "arbitrary"),
                vmem_limit_bytes=_VMEM_LIMIT,
            ),
            cost_estimate=cost,
        )(xp, yp, wxt, wyt, b)

    if mp != batch or np_ != d_out:
        out = out[:batch, :d_out]
    return x, y, out


if __name__ == "__main__":
    # Shapes consistent with the module defaults (input_dim=512, output_dim=100).
    B, D_in, D_out = 32, 512, 100

    key = jax.random.PRNGKey(0)
    kx, ky, kwx, kbx, kwy, kby = jax.random.split(key, 6)

    x = jax.random.normal(kx, (B, D_in), dtype=jnp.float32)
    y = jax.random.normal(ky, (B, D_in), dtype=jnp.float32)

    # nn.Linear-style uniform(-1/sqrt(fan_in), 1/sqrt(fan_in)) init.
    bound = 1.0 / (D_in ** 0.5)
    wx = jax.random.uniform(kwx, (D_out, D_in), jnp.float32, -bound, bound)
    bx = jax.random.uniform(kbx, (D_out,), jnp.float32, -bound, bound)
    wy = jax.random.uniform(kwy, (D_out, D_in), jnp.float32, -bound, bound)
    by = jax.random.uniform(kby, (D_out,), jnp.float32, -bound, bound)

    ref = x @ wx.T + bx + y @ wy.T + by

    # f32 path (matches the PyTorch reference numerics).
    params_f32 = prepare_sum_fusion_params(wx, bx, wy, by, compute_dtype=jnp.float32)
    x_out, y_out, out_f32 = sum_fusion(x, y, params_f32)
    jax.block_until_ready(out_f32)
    assert x_out.shape == (B, D_in) and y_out.shape == (B, D_in)
    assert out_f32.shape == (B, D_out)
    assert jnp.allclose(out_f32, ref, atol=1e-4, rtol=1e-4), "f32 mismatch vs reference"

    # bf16-operand path (activations AND weights in bf16; f32 accumulate/bias).
    params_bf16 = prepare_sum_fusion_params(wx, bx, wy, by, compute_dtype=jnp.bfloat16)
    _, _, out_bf16 = sum_fusion(x, y, params_bf16)
    jax.block_until_ready(out_bf16)
    assert jnp.allclose(out_bf16, ref, atol=5e-2, rtol=5e-2), "bf16 mismatch vs reference"

    print("KERNEL_OK")
</pallas_src>

<mosaic_0001>
module attributes {stable_mosaic.version = 11 : i64} {
  func.func @_sum_fusion_kernel_fused_k(%arg0: i32, %arg1: i32, %arg2: memref<32x512xf32, #tpu.memory_space<vmem>>, %arg3: memref<32x512xf32, #tpu.memory_space<vmem>>, %arg4: memref<512x128xf32, #tpu.memory_space<vmem>>, %arg5: memref<512x128xf32, #tpu.memory_space<vmem>>, %arg6: memref<1x128xf32, #tpu.memory_space<vmem>>, %arg7: memref<32x128xf32, #tpu.memory_space<vmem>>) attributes {dimension_semantics = [#tpu.dimension_semantics<parallel>, #tpu.dimension_semantics<parallel>], iteration_bounds = array<i64: 1, 1>, scalar_prefetch = 0 : i64, scratch_operands = 0 : i64, tpu.core_type = #tpu.core_type<tc>, window_params = [{transform_indices = @transform_0, window_bounds = array<i64: 32, 512>}, {transform_indices = @transform_1, window_bounds = array<i64: 32, 512>}, {transform_indices = @transform_2, window_bounds = array<i64: 512, 128>}, {transform_indices = @transform_3, window_bounds = array<i64: 512, 128>}, {transform_indices = @transform_4, window_bounds = array<i64: 1, 128>}, {transform_indices = @transform_5, window_bounds = array<i64: 32, 128>}]} {
    %c0 = arith.constant 0 : index
    %c0_0 = arith.constant 0 : index
    %0 = vector.load %arg2[%c0, %c0_0] : memref<32x512xf32, #tpu.memory_space<vmem>>, vector<32x512xf32>
    %c0_1 = arith.constant 0 : index
    %c0_2 = arith.constant 0 : index
    %1 = vector.load %arg4[%c0_1, %c0_2] : memref<512x128xf32, #tpu.memory_space<vmem>>, vector<512x128xf32>
    %cst = arith.constant dense<0.000000e+00> : vector<32x128xf32>
    %2 = tpu.matmul %0, %1, %cst {dimension_numbers = #tpu.dot_dimension_numbers<[1], [0], [0], [1], [0, 0, 1, 1], [], []>} : vector<32x512xf32>, vector<512x128xf32>, vector<32x128xf32> -> vector<32x128xf32>
    %c0_3 = arith.constant 0 : index
    %c0_4 = arith.constant 0 : index
    %3 = vector.load %arg3[%c0_3, %c0_4] : memref<32x512xf32, #tpu.memory_space<vmem>>, vector<32x512xf32>
    %c0_5 = arith.constant 0 : index
    %c0_6 = arith.constant 0 : index
    %4 = vector.load %arg5[%c0_5, %c0_6] : memref<512x128xf32, #tpu.memory_space<vmem>>, vector<512x128xf32>
    %cst_7 = arith.constant dense<0.000000e+00> : vector<32x128xf32>
    %5 = tpu.matmul %3, %4, %cst_7 {dimension_numbers = #tpu.dot_dimension_numbers<[1], [0], [0], [1], [0, 0, 1, 1], [], []>} : vector<32x512xf32>, vector<512x128xf32>, vector<32x128xf32> -> vector<32x128xf32>
    %6 = arith.addf %2, %5 : vector<32x128xf32>
    %c0_8 = arith.constant 0 : index
    %c0_9 = arith.constant 0 : index
    %7 = vector.load %arg6[%c0_8, %c0_9] : memref<1x128xf32, #tpu.memory_space<vmem>>, vector<1x128xf32>
    %8 = vector.broadcast %7 : vector<1x128xf32> to vector<32x128xf32>
    %9 = arith.addf %6, %8 : vector<32x128xf32>
    %c0_10 = arith.constant 0 : index
    %c0_11 = arith.constant 0 : index
    %10 = vector.load %arg7[%c0_10, %c0_11] : memref<32x128xf32, #tpu.memory_space<vmem>>, vector<32x128xf32>
    tpu.vector_store %arg7[%c0_10, %c0_11], %9 {strides = array<i32>} : memref<32x128xf32, #tpu.memory_space<vmem>>, vector<32x128xf32>,
    return
  }
  func.func @transform_0(%arg0: i32, %arg1: i32) -> (i32, i32) {
    %c0_i32 = arith.constant 0 : i32
    %c0_i32_0 = arith.constant 0 : i32
    return %arg1, %c0_i32 : i32, i32
  }
  func.func @transform_1(%arg0: i32, %arg1: i32) -> (i32, i32) {
    %c0_i32 = arith.constant 0 : i32
    %c0_i32_0 = arith.constant 0 : i32
    return %arg1, %c0_i32 : i32, i32
  }
  func.func @transform_2(%arg0: i32, %arg1: i32) -> (i32, i32) {
    %c0_i32 = arith.constant 0 : i32
    %c0_i32_0 = arith.constant 0 : i32
    return %c0_i32, %arg0 : i32, i32
  }
  func.func @transform_3(%arg0: i32, %arg1: i32) -> (i32, i32) {
    %c0_i32 = arith.constant 0 : i32
    %c0_i32_0 = arith.constant 0 : i32
    return %c0_i32, %arg0 : i32, i32
  }
  func.func @transform_4(%arg0: i32, %arg1: i32) -> (i32, i32) {
    %c0_i32 = arith.constant 0 : i32
    %c0_i32_0 = arith.constant 0 : i32
    return %c0_i32, %arg0 : i32, i32
  }
  func.func @transform_5(%arg0: i32, %arg1: i32) -> (i32, i32) {
    %c0_i32 = arith.constant 0 : i32
    return %arg1, %arg0 : i32, i32
  }
}

</mosaic_0001>

<bundles_post_ra>
// kernel: tpu_custom_call.1
= control target key start
LH: loop header
LB: loop body
LE: loop exit
PB: predicated region body
PF: predicated region fallthrough
CT: control target
= control target key end

     0   :  { %10 = vsyncpa [#allocation3], 0  ;;  %s713_s0 = inlined_call_operand.hbm [shape: f32[32,512], index: 0, kind: input, shape index: {}]   ;;  %s714_s1 = inlined_call_operand.hbm [shape: f32[32,512], index: 1, kind: input, shape index: {}]   ;;  %s715_s2 = inlined_call_operand.hbm [shape: f32[512,128], index: 2, kind: input, shape index: {}]   ;;  %s716_s3 = inlined_call_operand.hbm [shape: f32[512,128], index: 3, kind: input, shape index: {}]   ;;  %s717_s4 = inlined_call_operand.vmem [shape: f32[1,128], index: 4, kind: input, shape index: {}]   ;;  %s718_s5 = inlined_call_operand.hbm [shape: f32[32,128], index: 5, kind: output, shape index: {}]  }
   0x1   :  { %11 = vsyncpa [#allocation6], 0 }
   0x2   :  { %12 = vsyncpa [#allocation9], 0 }
   0x3   :  { %13 = vsyncpa [#allocation4], 0  ;;  %s31_s20 = sshll.u32 %s714_s1, 4  ;;  %s647_s21 = smov [#allocation5]   ;;  %s32_s20 = int_to_ptr.hbm [resolvable:$true] %s31_s20 }
   0x4   :  { %s33_s22 = sshll.u32 %s647_s21, 4  ;;  %s18_s25 = sshll.u32 %s713_s0, 4  ;;  %s34_s22 = int_to_ptr.vmem [resolvable:$true] %s33_s22  ;;  %s19_s25 = int_to_ptr.hbm [resolvable:$true] %s18_s25 }
   0x5   :  { %s648_s26 = smov 512   ;;  %s649_s27 = smov 32  }
   0x6   :  { %39 = dma.hbm_to_vmem [thread:$0]  %s32_s20, 2048, %s34_s22, [#allocation6], %s648_s26, %s648_s26, %s649_s27  }
   0x7   :  { %s650_s28 = smov [#allocation2]   ;;  %s44_s7 = sshll.u32 %s715_s2, 4  ;;  %s45_s7 = int_to_ptr.hbm [resolvable:$true] %s44_s7 }
   0x8   :  { %s20_s29 = sshll.u32 %s650_s28, 4  ;;  %s651_s1 = smov [#allocation7]   ;;  %s21_s29 = int_to_ptr.vmem [resolvable:$true] %s20_s29 }
   0x9   :  { %26 = dma.hbm_to_vmem [thread:$0]  %s19_s25, 2048, %s21_s29, [#allocation3], %s648_s26, %s648_s26, %s649_s27  }
   0xa   :  { %s46_s8 = sshll.u32 %s651_s1, 4  ;;  %s57_s0 = sshll.u32 %s716_s3, 4  ;;  %s47_s8 = int_to_ptr.vmem [resolvable:$true] %s46_s8  ;;  %s58_s0 = int_to_ptr.hbm [resolvable:$true] %s57_s0 }
   0xb   :  { %s652_s11 = smov 128   ;;  %s653_s12 = smov 8  }
   0xc   :  { %52 = dma.hbm_to_vmem [thread:$0]  %s45_s7, 8192, %s47_s8, [#allocation6], %s652_s11, %s652_s11, %s653_s12  }
   0xd   :  { %s654_s13 = smov [#allocation8]  }
   0xe   :  { %s59_s14 = sshll.u32 %s654_s13, 4  ;;  %s60_s14 = int_to_ptr.vmem [resolvable:$true] %s59_s14 }
   0xf   :  { %65 = dma.hbm_to_vmem [thread:$0]  %s58_s0, 8192, %s60_s14, [#allocation9], %s652_s11, %s652_s11, %s653_s12  }
  0x10   :  { %639 = dma.done.wait [#allocation3], 2048  }
  0x11   :  { %640 = vsyncadd [#allocation3], 4294965248 }
  0x12   :  { %641 = dma.done.wait [#allocation6], 10240  }
  0x13   :  { %642 = vsyncadd [#allocation6], 4294957056 }
  0x14   :  { %643 = dma.done.wait [#allocation9], 8192  }
  0x15   :  { %644 = vsyncadd [#allocation9], 4294959104  ;;  %v195_v0 = vld [vmem:[#allocation8 + $0x78] sm:$0xff]  ;;  %v194_v2 = vld [vmem:[#allocation8 + $0x70] sm:$0xff]  ;;  %s494_s18 = sshll.u32 %s718_s5, 4  ;;  %s495_s18 = int_to_ptr.hbm [resolvable:$true] %s494_s18 }
  0x16   :  { %v227_v1 = vld [vmem:[#allocation8 + $0x178] sm:$0xff]  ;;  %244 = vmatpush.msra.mxu0 %v195_v0  ;;  %v226_v4 = vld [vmem:[#allocation8 + $0x170] sm:$0xff]  ;;  %v193_v6 = vld [vmem:[#allocation8 + $0x68] sm:$0xff] }
  0x17   :  { %302 = vmatpush.msra.mxu2 %v227_v1  ;;  %v211_v3 = vld [vmem:[#allocation8 + $0xf8] sm:$0xff]  ;;  %v210_v7 = vld [vmem:[#allocation8 + $0xf0] sm:$0xff]  ;;  %v225_v8 = vld [vmem:[#allocation8 + $0x168] sm:$0xff] }
  0x18   :  { %v243_v5 = vld [vmem:[#allocation8 + $0x1f8] sm:$0xff]  ;;  %273 = vmatpush.msra.mxu1 %v211_v3  ;;  %245 = vmatpush.msra.mxu0 %v194_v2  ;;  %v242_v9 = vld [vmem:[#allocation8 + $0x1f0] sm:$0xff]  ;;  %v209_v10 = vld [vmem:[#allocation8 + $0xe8] sm:$0xff] }
  0x19   :  { %331 = vmatpush.msra.mxu3 %v243_v5  ;;  %303 = vmatpush.msra.mxu2 %v226_v4  ;;  %v192_v11 = vld [vmem:[#allocation8 + $0x60] sm:$0xff]  ;;  %v241_v13 = vld [vmem:[#allocation8 + $0x1e8] sm:$0xff]  ;;  %v191_v16 = vld [vmem:[#allocation8 + $0x58] sm:$0xff] }
  0x1a   :  { %274 = vmatpush.msra.mxu1 %v210_v7  ;;  %v224_v12 = vld [vmem:[#allocation8 + $0x160] sm:$0xff]  ;;  %246 = vmatpush.msra.mxu0 %v193_v6  ;;  %v223_v17 = vld [vmem:[#allocation8 + $0x158] sm:$0xff]  ;;  %v190_v20 = vld [vmem:[#allocation8 + $0x50] sm:$0xff] }
  0x1b   :  { %332 = vmatpush.msra.mxu3 %v242_v9  ;;  %304 = vmatpush.msra.mxu2 %v225_v8  ;;  %v208_v14 = vld [vmem:[#allocation8 + $0xe0] sm:$0xff]  ;;  %v207_v18 = vld [vmem:[#allocation8 + $0xd8] sm:$0xff]  ;;  %v222_v21 = vld [vmem:[#allocation8 + $0x150] sm:$0xff] }
  0x1c   :  { %v240_v15 = vld [vmem:[#allocation8 + $0x1e0] sm:$0xff]  ;;  %275 = vmatpush.msra.mxu1 %v209_v10  ;;  %247 = vmatpush.msra.mxu0 %v192_v11  ;;  %v239_v19 = vld [vmem:[#allocation8 + $0x1d8] sm:$0xff]  ;;  %v206_v22 = vld [vmem:[#allocation8 + $0xd0] sm:$0xff] }
  0x1d   :  { %333 = vmatpush.msra.mxu3 %v241_v13  ;;  %305 = vmatpush.msra.mxu2 %v224_v12  ;;  %v238_v23 = vld [vmem:[#allocation8 + $0x1d0] sm:$0xff]  ;;  %v189_v24 = vld [vmem:[#allocation8 + $0x48] sm:$0xff]  ;;  %v188_v28 = vld [vmem:[#allocation8 + $0x40] sm:$0xff] }
  0x1e   :  { %276 = vmatpush.msra.mxu1 %v208_v14  ;;  %248 = vmatpush.msra.mxu0 %v191_v16  ;;  %v221_v25 = vld [vmem:[#allocation8 + $0x148] sm:$0xff]  ;;  %v220_v29 = vld [vmem:[#allocation8 + $0x140] sm:$0xff]  ;;  %v187_v32 = vld [vmem:[#allocation8 + $0x38] sm:$0xff] }
  0x1f   :  { %334 = vmatpush.msra.mxu3 %v240_v15  ;;  %306 = vmatpush.msra.mxu2 %v223_v17  ;;  %v205_v26 = vld [vmem:[#allocation8 + $0xc8] sm:$0xff]  ;;  %v204_v30 = vld [vmem:[#allocation8 + $0xc0] sm:$0xff]  ;;  %v219_v33 = vld [vmem:[#allocation8 + $0x138] sm:$0xff] }
  0x20   :  { %277 = vmatpush.msra.mxu1 %v207_v18  ;;  %249 = vmatpush.msra.mxu0 %v190_v20  ;;  %v237_v27 = vld [vmem:[#allocation8 + $0x1c8] sm:$0xff]  ;;  %v236_v31 = vld [vmem:[#allocation8 + $0x1c0] sm:$0xff]  ;;  %v203_v34 = vld [vmem:[#allocation8 + $0xb8] sm:$0xff] }
  0x21   :  { %335 = vmatpush.msra.mxu3 %v239_v19  ;;  %307 = vmatpush.msra.mxu2 %v222_v21  ;;  %v235_v35 = vld [vmem:[#allocation8 + $0x1b8] sm:$0xff]  ;;  %v186_v36 = vld [vmem:[#allocation8 + $0x30] sm:$0xff]  ;;  %v185_v40 = vld [vmem:[#allocation8 + $0x28] sm:$0xff] }
  0x22   :  { %278 = vmatpush.msra.mxu1 %v206_v22  ;;  %250 = vmatpush.msra.mxu0 %v189_v24  ;;  %v218_v37 = vld [vmem:[#allocation8 + $0x130] sm:$0xff]  ;;  %v217_v41 = vld [vmem:[#allocation8 + $0x128] sm:$0xff]  ;;  %v184_v44 = vld [vmem:[#allocation8 + $0x20] sm:$0xff] }
  0x23   :  { %336 = vmatpush.msra.mxu3 %v238_v23  ;;  %308 = vmatpush.msra.mxu2 %v221_v25  ;;  %v202_v38 = vld [vmem:[#allocation8 + $0xb0] sm:$0xff]  ;;  %v201_v42 = vld [vmem:[#allocation8 + $0xa8] sm:$0xff]  ;;  %v216_v45 = vld [vmem:[#allocation8 + $0x120] sm:$0xff] }
  0x24   :  { %279 = vmatpush.msra.mxu1 %v205_v26  ;;  %251 = vmatpush.msra.mxu0 %v188_v28  ;;  %v234_v39 = vld [vmem:[#allocation8 + $0x1b0] sm:$0xff]  ;;  %v233_v43 = vld [vmem:[#allocation8 + $0x1a8] sm:$0xff]  ;;  %v200_v46 = vld [vmem:[#allocation8 + $0xa0] sm:$0xff] }
  0x25   :  { %337 = vmatpush.msra.mxu3 %v237_v27  ;;  %309 = vmatpush.msra.mxu2 %v220_v29  ;;  %v232_v47 = vld [vmem:[#allocation8 + $0x1a0] sm:$0xff]  ;;  %v183_v48 = vld [vmem:[#allocation8 + $0x18] sm:$0xff]  ;;  %v182_v52 = vld [vmem:[#allocation8 + $0x10] sm:$0xff] }
  0x26   :  { %280 = vmatpush.msra.mxu1 %v204_v30  ;;  %252 = vmatpush.msra.mxu0 %v187_v32  ;;  %v215_v49 = vld [vmem:[#allocation8 + $0x118] sm:$0xff]  ;;  %v214_v53 = vld [vmem:[#allocation8 + $0x110] sm:$0xff]  ;;  %v181_v56 = vld [vmem:[#allocation8 + $0x8] sm:$0xff] }
  0x27   :  { %338 = vmatpush.msra.mxu3 %v236_v31  ;;  %310 = vmatpush.msra.mxu2 %v219_v33  ;;  %v199_v50 = vld [vmem:[#allocation8 + $0x98] sm:$0xff]  ;;  %v198_v54 = vld [vmem:[#allocation8 + $0x90] sm:$0xff]  ;;  %v213_v57 = vld [vmem:[#allocation8 + $0x108] sm:$0xff] }
  0x28   :  { %281 = vmatpush.msra.mxu1 %v203_v34  ;;  %253 = vmatpush.msra.mxu0 %v186_v36  ;;  %v231_v51 = vld [vmem:[#allocation8 + $0x198] sm:$0xff]  ;;  %v230_v55 = vld [vmem:[#allocation8 + $0x190] sm:$0xff]  ;;  %v197_v58 = vld [vmem:[#allocation8 + $0x88] sm:$0xff] }
  0x29   :  { %339 = vmatpush.msra.mxu3 %v235_v35  ;;  %311 = vmatpush.msra.mxu2 %v218_v37  ;;  %v229_v59 = vld [vmem:[#allocation8 + $0x188] sm:$0xff]  ;;  %v180_v60 = vld [vmem:[#allocation8] sm:$0xff]  ;;  %v166_v63 = vld [vmem:[#allocation5 + $0x10] sm:$0xff] }
  0x2a   :  { %282 = vmatpush.msra.mxu1 %v202_v38  ;;  %254 = vmatpush.msra.mxu0 %v185_v40  ;;  %v212_v61 = vld [vmem:[#allocation8 + $0x100] sm:$0xff]  ;;  %v147_v0 = vld [vmem:[#allocation7 + $0x178] sm:$0xff]  ;;  %v165_v4 = vld [vmem:[#allocation5 + $0x8] sm:$0xff] }
  0x2b   :  { %340 = vmatpush.msra.mxu3 %v234_v39  ;;  %312 = vmatpush.msra.mxu2 %v217_v41  ;;  %v164_v62 = vld [vmem:[#allocation5] sm:$0xff]  ;;  %v115_v3 = vld [vmem:[#allocation7 + $0x78] sm:$0xff]  ;;  %v146_v6 = vld [vmem:[#allocation7 + $0x170] sm:$0xff] }
  0x2c   :  { %283 = vmatpush.msra.mxu1 %v201_v42  ;;  %255 = vmatpush.msra.mxu0 %v184_v44  ;;  %v196_v1 = vld [vmem:[#allocation8 + $0x80] sm:$0xff]  ;;  %v167_v5 = vld [vmem:[#allocation5 + $0x18] sm:$0xff]  ;;  %v114_v8 = vld [vmem:[#allocation7 + $0x70] sm:$0xff] }
  0x2d   :  { %341 = vmatpush.msra.mxu3 %v233_v43  ;;  %313 = vmatpush.msra.mxu2 %v216_v45  ;;  %v228_v2 = vld [vmem:[#allocation8 + $0x180] sm:$0xff]  ;;  %v163_v7 = vld [vmem:[#allocation7 + $0x1f8] sm:$0xff]  ;;  %v145_v10 = vld [vmem:[#allocation7 + $0x168] sm:$0xff] }
  0x2e   :  { %284 = vmatpush.msra.mxu1 %v200_v46  ;;  %256 = vmatpush.msra.mxu0 %v183_v48  ;;  %v131_v9 = vld [vmem:[#allocation7 + $0xf8] sm:$0xff]  ;;  %v162_v11 = vld [vmem:[#allocation7 + $0x1f0] sm:$0xff]  ;;  %v113_v12 = vld [vmem:[#allocation7 + $0x68] sm:$0xff] }
  0x2f   :  { %342 = vmatpush.msra.mxu3 %v232_v47  ;;  %314 = vmatpush.msra.mxu2 %v215_v49  ;;  %v130_v13 = vld [vmem:[#allocation7 + $0xf0] sm:$0xff]  ;;  %v144_v14 = vld [vmem:[#allocation7 + $0x160] sm:$0xff]  ;;  %v161_v15 = vld [vmem:[#allocation7 + $0x1e8] sm:$0xff] }
  0x30   :  { %285 = vmatpush.msra.mxu1 %v199_v50  ;;  %257 = vmatpush.msra.mxu0 %v182_v52  ;;  %v112_v16 = vld [vmem:[#allocation7 + $0x60] sm:$0xff]  ;;  %v129_v17 = vld [vmem:[#allocation7 + $0xe8] sm:$0xff]  ;;  %v170_v19 = vld [vmem:[#allocation5 + $0x30] sm:$0xff] }
  0x31   :  { %343 = vmatpush.msra.mxu3 %v231_v51  ;;  %315 = vmatpush.msra.mxu2 %v214_v53  ;;  %v168_v18 = vld [vmem:[#allocation5 + $0x20] sm:$0xff]  ;;  %v143_v20 = vld [vmem:[#allocation7 + $0x158] sm:$0xff]  ;;  %v169_v24 = vld [vmem:[#allocation5 + $0x28] sm:$0xff] }
  0x32   :  { %286 = vmatpush.msra.mxu1 %v198_v54  ;;  %258 = vmatpush.msra.mxu0 %v181_v56  ;;  %v160_v21 = vld [vmem:[#allocation7 + $0x1e0] sm:$0xff]  ;;  %v111_v22 = vld [vmem:[#allocation7 + $0x58] sm:$0xff]  ;;  %v142_v26 = vld [vmem:[#allocation7 + $0x150] sm:$0xff] }
  0x33   :  { %344 = vmatpush.msra.mxu3 %v230_v55  ;;  %316 = vmatpush.msra.mxu2 %v213_v57  ;;  %v128_v23 = vld [vmem:[#allocation7 + $0xe0] sm:$0xff]  ;;  %v171_v25 = vld [vmem:[#allocation5 + $0x38] sm:$0xff]  ;;  %v110_v28 = vld [vmem:[#allocation7 + $0x50] sm:$0xff] }
  0x34   :  { %287 = vmatpush.msra.mxu1 %v197_v58  ;;  %259 = vmatpush.msra.mxu0 %v180_v60  ;;  %v159_v27 = vld [vmem:[#allocation7 + $0x1d8] sm:$0xff]  ;;  %v141_v30 = vld [vmem:[#allocation7 + $0x148] sm:$0xff]  ;;  %v158_v31 = vld [vmem:[#allocation7 + $0x1d0] sm:$0xff] }
  0x35   :  { %345 = vmatpush.msra.mxu3 %v229_v59  ;;  %317 = vmatpush.msra.mxu2 %v212_v61  ;;  %v127_v29 = vld [vmem:[#allocation7 + $0xd8] sm:$0xff]  ;;  %v109_v32 = vld [vmem:[#allocation7 + $0x48] sm:$0xff]  ;;  %v126_v33 = vld [vmem:[#allocation7 + $0xd0] sm:$0xff] }
  0x36   :  { %260 = vmatmul.f32.vlgmr.msra.gmra.mxu0 %v164_v62  ;;  %318 = vmatmul.f32.vlgmr.msra.gmra.mxu2 %v166_v63  ;;  %v140_v34 = vld [vmem:[#allocation7 + $0x140] sm:$0xff]  ;;  %v157_v35 = vld [vmem:[#allocation7 + $0x1c8] sm:$0xff]  ;;  %v174_v39 = vld [vmem:[#allocation5 + $0x50] sm:$0xff] }
  0x37   :  { %418 = vmatpush.msrb.mxu2 %v147_v0  ;;  %288 = vmatpush.msra.mxu1 %v196_v1  ;;  %v108_v36 = vld [vmem:[#allocation7 + $0x40] sm:$0xff]  ;;  %v125_v37 = vld [vmem:[#allocation7 + $0xc8] sm:$0xff]  ;;  %v139_v40 = vld [vmem:[#allocation7 + $0x138] sm:$0xff] }
  0x38   :  { %346 = vmatpush.msra.mxu3 %v228_v2  ;;  %360 = vmatpush.msrb.mxu0 %v115_v3  ;;  %v172_v38 = vld [vmem:[#allocation5 + $0x40] sm:$0xff]  ;;  %v107_v42 = vld [vmem:[#allocation7 + $0x38] sm:$0xff]  ;;  %v173_v44 = vld [vmem:[#allocation5 + $0x48] sm:$0xff] }
  0x39   :  { %289 = vmatmul.f32.vlgmr.msra.gmra.mxu1 %v165_v4  ;;  %347 = vmatmul.f32.vlgmr.msra.gmra.mxu3 %v167_v5  ;;  %v156_v41 = vld [vmem:[#allocation7 + $0x1c0] sm:$0xff]  ;;  %v175_v45 = vld [vmem:[#allocation5 + $0x58] sm:$0xff]  ;;  %v138_v46 = vld [vmem:[#allocation7 + $0x130] sm:$0xff] }
  0x3a   :  { %419 = vmatpush.msrb.mxu2 %v146_v6  ;;  %447 = vmatpush.msrb.mxu3 %v163_v7  ;;  %v124_v43 = vld [vmem:[#allocation7 + $0xc0] sm:$0xff]  ;;  %v155_v47 = vld [vmem:[#allocation7 + $0x1b8] sm:$0xff]  ;;  %v106_v48 = vld [vmem:[#allocation7 + $0x30] sm:$0xff] }
  0x3b   :  { %361 = vmatpush.msrb.mxu0 %v114_v8  ;;  %389 = vmatpush.msrb.mxu1 %v131_v9  ;;  %v123_v49 = vld [vmem:[#allocation7 + $0xb8] sm:$0xff]  ;;  %v137_v50 = vld [vmem:[#allocation7 + $0x128] sm:$0xff]  ;;  %v154_v51 = vld [vmem:[#allocation7 + $0x1b0] sm:$0xff] }
  0x3c   :  { %420 = vmatpush.msrb.mxu2 %v145_v10  ;;  %448 = vmatpush.msrb.mxu3 %v162_v11  ;;  %v105_v52 = vld [vmem:[#allocation7 + $0x28] sm:$0xff]  ;;  %v122_v53 = vld [vmem:[#allocation7 + $0xb0] sm:$0xff]  ;;  %v136_v54 = vld [vmem:[#allocation7 + $0x120] sm:$0xff] }
  0x3d   :  { %362 = vmatpush.msrb.mxu0 %v113_v12  ;;  %390 = vmatpush.msrb.mxu1 %v130_v13  ;;  %v153_v55 = vld [vmem:[#allocation7 + $0x1a8] sm:$0xff]  ;;  %v104_v56 = vld [vmem:[#allocation7 + $0x20] sm:$0xff]  ;;  %v178_v59 = vld [vmem:[#allocation5 + $0x70] sm:$0xff] }
  0x3e   :  { %421 = vmatpush.msrb.mxu2 %v144_v14  ;;  %449 = vmatpush.msrb.mxu3 %v161_v15  ;;  %v121_v57 = vld [vmem:[#allocation7 + $0xa8] sm:$0xff]  ;;  %v176_v58 = vld [vmem:[#allocation5 + $0x60] sm:$0xff]  ;;  %v135_v60 = vld [vmem:[#allocation7 + $0x118] sm:$0xff] }
  0x3f   :  { %363 = vmatpush.msrb.mxu0 %v112_v16  ;;  %391 = vmatpush.msrb.mxu1 %v129_v17  ;;  %v152_v61 = vld [vmem:[#allocation7 + $0x1a0] sm:$0xff]  ;;  %v103_v62 = vld [vmem:[#allocation7 + $0x18] sm:$0xff]  ;;  %v177_v0 = vld [vmem:[#allocation5 + $0x68] sm:$0xff] }
  0x40   :  { %263 = vmatmul.f32.gmra.mxu0 %v168_v18  ;;  %321 = vmatmul.f32.gmra.mxu2 %v170_v19  ;;  %v120_v63 = vld [vmem:[#allocation7 + $0xa0] sm:$0xff]  ;;  %v179_v1 = vld [vmem:[#allocation5 + $0x78] sm:$0xff]  ;;  %v134_v2 = vld [vmem:[#allocation7 + $0x110] sm:$0xff] }
  0x41   :  { %422 = vmatpush.msrb.mxu2 %v143_v20  ;;  %450 = vmatpush.msrb.mxu3 %v160_v21  ;;  %v151_v3 = vld [vmem:[#allocation7 + $0x198] sm:$0xff]  ;;  %v102_v4 = vld [vmem:[#allocation7 + $0x10] sm:$0xff]  ;;  %v133_v6 = vld [vmem:[#allocation7 + $0x108] sm:$0xff] }
  0x42   :  { %364 = vmatpush.msrb.mxu0 %v111_v22  ;;  %392 = vmatpush.msrb.mxu1 %v128_v23  ;;  %v119_v5 = vld [vmem:[#allocation7 + $0x98] sm:$0xff]  ;;  %v150_v7 = vld [vmem:[#allocation7 + $0x190] sm:$0xff]  ;;  %v101_v8 = vld [vmem:[#allocation7 + $0x8] sm:$0xff] }
  0x43   :  { %292 = vmatmul.f32.gmra.mxu1 %v169_v24  ;;  %350 = vmatmul.f32.gmra.mxu3 %v171_v25  ;;  %v118_v9 = vld [vmem:[#allocation7 + $0x90] sm:$0xff]  ;;  %v132_v10 = vld [vmem:[#allocation7 + $0x100] sm:$0xff]  ;;  %v149_v11 = vld [vmem:[#allocation7 + $0x188] sm:$0xff] }
  0x44   :  { %423 = vmatpush.msrb.mxu2 %v142_v26  ;;  %451 = vmatpush.msrb.mxu3 %v159_v27  ;;  %v100_v12 = vld [vmem:[#allocation7] sm:$0xff]  ;;  %v117_v13 = vld [vmem:[#allocation7 + $0x88] sm:$0xff]  ;;  %v86_v15 = vld [vmem:[#allocation2 + $0x10] sm:$0xff] }
  0x45   :  { %365 = vmatpush.msrb.mxu0 %v110_v28  ;;  %393 = vmatpush.msrb.mxu1 %v127_v29  ;;  %v84_v14 = vld [vmem:[#allocation2] sm:$0xff]  ;;  %v85_v18 = vld [vmem:[#allocation2 + $0x8] sm:$0xff]  ;;  %v87_v19 = vld [vmem:[#allocation2 + $0x18] sm:$0xff] }
  0x46   :  { %424 = vmatpush.msrb.mxu2 %v141_v30  ;;  %452 = vmatpush.msrb.mxu3 %v158_v31  ;;  %v148_v16 = vld [vmem:[#allocation7 + $0x180] sm:$0xff]  ;;  %v90_v21 = vld [vmem:[#allocation2 + $0x30] sm:$0xff]  ;;  %v89_v22 = vld [vmem:[#allocation2 + $0x28] sm:$0xff] }
  0x47   :  { %366 = vmatpush.msrb.mxu0 %v109_v32  ;;  %394 = vmatpush.msrb.mxu1 %v126_v33  ;;  %v116_v17 = vld [vmem:[#allocation7 + $0x80] sm:$0xff]  ;;  %v91_v23 = vld [vmem:[#allocation2 + $0x38] sm:$0xff]  ;;  %v94_v25 = vld [vmem:[#allocation2 + $0x50] sm:$0xff] }
  0x48   :  { %425 = vmatpush.msrb.mxu2 %v140_v34  ;;  %453 = vmatpush.msrb.mxu3 %v157_v35  ;;  %v88_v20 = vld [vmem:[#allocation2 + $0x20] sm:$0xff]  ;;  %v93_v26 = vld [vmem:[#allocation2 + $0x48] sm:$0xff]  ;;  %v95_v27 = vld [vmem:[#allocation2 + $0x58] sm:$0xff] }
  0x49   :  { %367 = vmatpush.msrb.mxu0 %v108_v36  ;;  %395 = vmatpush.msrb.mxu1 %v125_v37  ;;  %v92_v24 = vld [vmem:[#allocation2 + $0x40] sm:$0xff]  ;;  %v98_v29 = vld [vmem:[#allocation2 + $0x70] sm:$0xff]  ;;  %v97_v30 = vld [vmem:[#allocation2 + $0x68] sm:$0xff] }
  0x4a   :  { %266 = vmatmul.f32.gmra.mxu0 %v172_v38  ;;  %324 = vmatmul.f32.gmra.mxu2 %v174_v39  ;;  %v96_v28 = vld [vmem:[#allocation2 + $0x60] sm:$0xff]  ;;  %v99_v31 = vld [vmem:[#allocation2 + $0x78] sm:$0xff] }
  0x4b   :  { %426 = vmatpush.msrb.mxu2 %v139_v40  ;;  %454 = vmatpush.msrb.mxu3 %v156_v41 }
  0x4c   :  { %368 = vmatpush.msrb.mxu0 %v107_v42  ;;  %396 = vmatpush.msrb.mxu1 %v124_v43 }
  0x4d   :  { %295 = vmatmul.f32.gmra.mxu1 %v173_v44  ;;  %353 = vmatmul.f32.gmra.mxu3 %v175_v45 }
  0x4e   :  { %427 = vmatpush.msrb.mxu2 %v138_v46  ;;  %455 = vmatpush.msrb.mxu3 %v155_v47 }
  0x4f   :  { %369 = vmatpush.msrb.mxu0 %v106_v48  ;;  %397 = vmatpush.msrb.mxu1 %v123_v49 }
  0x50   :  { %428 = vmatpush.msrb.mxu2 %v137_v50  ;;  %456 = vmatpush.msrb.mxu3 %v154_v51 }
  0x51   :  { %370 = vmatpush.msrb.mxu0 %v105_v52  ;;  %398 = vmatpush.msrb.mxu1 %v122_v53 }
  0x52   :  { %429 = vmatpush.msrb.mxu2 %v136_v54  ;;  %457 = vmatpush.msrb.mxu3 %v153_v55 }
  0x53   :  { %371 = vmatpush.msrb.mxu0 %v104_v56  ;;  %399 = vmatpush.msrb.mxu1 %v121_v57 }
  0x54   :  { %269 = vmatmul.f32.gmra.mxu0 %v176_v58  ;;  %327 = vmatmul.f32.gmra.mxu2 %v178_v59 }
  0x55   :  { %430 = vmatpush.msrb.mxu2 %v135_v60  ;;  %458 = vmatpush.msrb.mxu3 %v152_v61  ;;  %v518_v60 = vld [vmem:[%s717_s4] ss:$0 sm:$0xff]  ;;  %s655_s4 = smov [#allocation10]  }
  0x56   :  { %372 = vmatpush.msrb.mxu0 %v103_v62  ;;  %400 = vmatpush.msrb.mxu1 %v120_v63  ;;  %s492_s15 = sshll.u32 %s655_s4, 4  ;;  %s493_s15 = int_to_ptr.vmem [resolvable:$true] %s492_s15 }
  0x57   :  { %298 = vmatmul.f32.gmra.mxu1 %v177_v0  ;;  %356 = vmatmul.f32.gmra.mxu3 %v179_v1 }
  0x58   :  { %431 = vmatpush.msrb.mxu2 %v134_v2  ;;  %459 = vmatpush.msrb.mxu3 %v151_v3 }
  0x59   :  { %373 = vmatpush.msrb.mxu0 %v102_v4  ;;  %401 = vmatpush.msrb.mxu1 %v119_v5 }
  0x5a   :  { %432 = vmatpush.msrb.mxu2 %v133_v6  ;;  %460 = vmatpush.msrb.mxu3 %v150_v7 }
  0x5b   :  { %374 = vmatpush.msrb.mxu0 %v101_v8  ;;  %402 = vmatpush.msrb.mxu1 %v118_v9 }
  0x5c   :  { %433 = vmatpush.msrb.mxu2 %v132_v10  ;;  %461 = vmatpush.msrb.mxu3 %v149_v11 }
  0x5d   :  { %375 = vmatpush.msrb.mxu0 %v100_v12  ;;  %403 = vmatpush.msrb.mxu1 %v117_v13 }
  0x5e   :  { %376 = vmatmul.f32.vlgmr.msrb.gmra.mxu0 %v84_v14  ;;  %434 = vmatmul.f32.vlgmr.msrb.gmra.mxu2 %v86_v15 }
  0x5f   :  { %462 = vmatpush.msrb.mxu3 %v148_v16  ;;  %404 = vmatpush.msrb.mxu1 %v116_v17 }
  0x60   :  { %405 = vmatmul.f32.vlgmr.msrb.gmra.mxu1 %v85_v18  ;;  %463 = vmatmul.f32.vlgmr.msrb.gmra.mxu3 %v87_v19 }
  0x66   :  { %379 = vmatmul.f32.gmra.mxu0 %v88_v20  ;;  %437 = vmatmul.f32.gmra.mxu2 %v90_v21 }
  0x68   :  { %408 = vmatmul.f32.gmra.mxu1 %v89_v22  ;;  %466 = vmatmul.f32.gmra.mxu3 %v91_v23 }
  0x6e   :  { %382 = vmatmul.f32.gmra.mxu0 %v92_v24  ;;  %440 = vmatmul.f32.gmra.mxu2 %v94_v25 }
  0x70   :  { %411 = vmatmul.f32.gmra.mxu1 %v93_v26  ;;  %469 = vmatmul.f32.gmra.mxu3 %v95_v27 }
  0x76   :  { %385 = vmatmul.f32.gmra.mxu0 %v96_v28  ;;  %443 = vmatmul.f32.gmra.mxu2 %v98_v29 }
  0x78   :  { %414 = vmatmul.f32.gmra.mxu1 %v97_v30  ;;  %472 = vmatmul.f32.gmra.mxu3 %v99_v31 }
  0xb3   :  { %v261_v32 = vpop.f32.mrf.mxu0 }
  0xb6   :  { %v290_v33 = vpop.f32.mrf.mxu1 }
  0xb7   :  { %v291_v45 = vadd.f32 %v290_v33, %v261_v32 }
  0xb9   :  { %v319_v34 = vpop.f32.mrf.mxu2 }
  0xba   :  { %v320_v47 = vadd.f32 %v319_v34, %v291_v45 }
  0xbc   :  { %v348_v35 = vpop.f32.mrf.mxu3 }
  0xbd   :  { %v264_v36 = vpop.f32.mrf.mxu0  ;;  %v349_v49 = vadd.f32 %v348_v35, %v320_v47 }
  0xc0   :  { %v293_v37 = vpop.f32.mrf.mxu1 }
  0xc1   :  { %v294_v52 = vadd.f32 %v293_v37, %v264_v36 }
  0xc3   :  { %v322_v38 = vpop.f32.mrf.mxu2 }
  0xc4   :  { %v323_v55 = vadd.f32 %v322_v38, %v294_v52 }
  0xc6   :  { %v351_v39 = vpop.f32.mrf.mxu3 }
  0xc7   :  { %v267_v40 = vpop.f32.mrf.mxu0  ;;  %v352_v58 = vadd.f32 %v351_v39, %v323_v55 }
  0xca   :  { %v296_v41 = vpop.f32.mrf.mxu1 }
  0xcb   :  { %v297_v63 = vadd.f32 %v296_v41, %v267_v40 }
  0xcd   :  { %v325_v42 = vpop.f32.mrf.mxu2 }
  0xce   :  { %v326_v3 = vadd.f32 %v325_v42, %v297_v63 }
  0xd0   :  { %v354_v43 = vpop.f32.mrf.mxu3 }
  0xd1   :  { %v270_v44 = vpop.f32.mrf.mxu0  ;;  %v355_v7 = vadd.f32 %v354_v43, %v326_v3 }
  0xd4   :  { %v299_v46 = vpop.f32.mrf.mxu1 }
  0xd5   :  { %v300_v11 = vadd.f32 %v299_v46, %v270_v44 }
  0xd7   :  { %v328_v48 = vpop.f32.mrf.mxu2 }
  0xd8   :  { %v329_v15 = vadd.f32 %v328_v48, %v300_v11 }
  0xda   :  { %v357_v50 = vpop.f32.mrf.mxu3 }
  0xdb   :  { %v377_v51 = vpop.f32.mrf.mxu0  ;;  %v358_v19 = vadd.f32 %v357_v50, %v329_v15 }
  0xdc   :  { %v378_v53 = vadd.f32 %v377_v51, %v349_v49 }
  0xdd   :  { %v406_v54 = vpop.f32.mrf.mxu1 }
  0xde   :  { %v407_v56 = vadd.f32 %v406_v54, %v378_v53 }
  0xe1   :  { %v435_v57 = vpop.f32.mrf.mxu2 }
  0xe2   :  { %v436_v59 = vadd.f32 %v435_v57, %v407_v56 }
  0xe3   :  { %v380_v61 = vpop.f32.mrf.mxu0  ;;  %v464_v62 = vpop.f32.mrf.mxu3 }
  0xe4   :  { %v381_v0 = vadd.f32 %v380_v61, %v352_v58  ;;  %v465_v1 = vadd.f32 %v464_v62, %v436_v59 }
  0xe5   :  { %v409_v2 = vpop.f32.mrf.mxu1 }
  0xe6   :  { %v480_v4 = vadd.f32 %v518_v60, %v465_v1  ;;  %v410_v5 = vadd.f32 %v409_v2, %v381_v0 }
  0xe8   :  { %484 = vst [vmem:[#allocation10] sm:$0xff] %v480_v4 }
  0xe9   :  { %v438_v6 = vpop.f32.mrf.mxu2 }
  0xea   :  { %v439_v8 = vadd.f32 %v438_v6, %v410_v5 }
  0xeb   :  { %v383_v9 = vpop.f32.mrf.mxu0  ;;  %v467_v10 = vpop.f32.mrf.mxu3 }
  0xec   :  { %v384_v12 = vadd.f32 %v383_v9, %v355_v7  ;;  %v468_v13 = vadd.f32 %v467_v10, %v439_v8 }
  0xed   :  { %v412_v14 = vpop.f32.mrf.mxu1 }
  0xee   :  { %v481_v16 = vadd.f32 %v518_v60, %v468_v13  ;;  %v413_v17 = vadd.f32 %v412_v14, %v384_v12 }
  0xf0   :  { %485 = vst [vmem:[#allocation10 + $0x8] sm:$0xff] %v481_v16 }
  0xf1   :  { %v441_v18 = vpop.f32.mrf.mxu2 }
  0xf2   :  { %v442_v20 = vadd.f32 %v441_v18, %v413_v17 }
  0xf3   :  { %v386_v21 = vpop.f32.mrf.mxu0  ;;  %v470_v22 = vpop.f32.mrf.mxu3 }
  0xf4   :  { %v387_v23 = vadd.f32 %v386_v21, %v358_v19  ;;  %v471_v24 = vadd.f32 %v470_v22, %v442_v20 }
  0xf5   :  { %v415_v25 = vpop.f32.mrf.mxu1 }
  0xf6   :  { %v482_v26 = vadd.f32 %v518_v60, %v471_v24  ;;  %v416_v27 = vadd.f32 %v415_v25, %v387_v23 }
  0xf8   :  { %486 = vst [vmem:[#allocation10 + $0x10] sm:$0xff] %v482_v26 }
  0xf9   :  { %v444_v28 = vpop.f32.mrf.mxu2 }
  0xfa   :  { %v445_v29 = vadd.f32 %v444_v28, %v416_v27 }
  0xfb   :  { %v473_v30 = vpop.f32.mrf.mxu3 }
  0xfc   :  { %v474_v31 = vadd.f32 %v473_v30, %v445_v29 }
  0xfe   :  { %v483_v32 = vadd.f32 %v518_v60, %v474_v31 }
 0x100   :  { %487 = vst [vmem:[#allocation10 + $0x18] sm:$0xff] %v483_v32 }
 0x101   :  { %500 = dma.vmem_to_hbm [thread:$0]  %s493_s15, 512, %s495_s18, [#allocation4], %s652_s11, %s652_s11, %s653_s12  }
 0x102   :  { %645 = dma.done.wait [#allocation4], 512  }
 0x103   :  { %646 = vsyncadd [#allocation4], 4294966784 }
 0x104   :  { %505 = vsyncpa [#allocation3], 1 }
 0x105   :  { %506 = vsyncpa [#allocation6], 1 }
 0x106   :  { %507 = vsyncpa [#allocation9], 1 }
 0x107   :  { %508 = vsyncpa [#allocation4], 1 }

</bundles_post_ra>
